<compile_context>
chip_gen: v6e
topology: v6e:2x2x1
jax: 0.10.0
libtpu: 0.0.40
codegen_flags: <defaults>
</compile_context>

<pallas_src>
import jax
import jax.numpy as jnp
from jax.experimental import pallas as pl
from jax.experimental.pallas import tpu as pltpu


def value_net_kernel(x_ref, w1_ref, b1_ref, w2_ref, b2_ref, o_ref):
    """Fused MLP block: out = relu(x @ w1 + b1) @ w2 + b2 (f32 accumulation)."""
    # fc1 on the MXU in the weights' dtype (bf16-native when weights are bf16),
    # f32 accumulation; bias + ReLU stay f32 on the VPU.
    x = x_ref[...].astype(w1_ref.dtype)
    h = jnp.dot(x, w1_ref[...], preferred_element_type=jnp.float32)
    h = jnp.maximum(h + b1_ref[...].astype(jnp.float32), 0.0)      # (TB, H) f32
    # fc2 on the MXU, f32 accumulation; store only the real O columns.
    out = jnp.dot(h.astype(w2_ref.dtype), w2_ref[...],
                  preferred_element_type=jnp.float32)
    out = out + b2_ref[...].astype(jnp.float32)                    # (TB, O)
    o_ref[...] = out.astype(o_ref.dtype)


def _round_up(n, m):
    return ((n + m - 1) // m) * m


def value_network_forward(x, w1, b1, w2, b2, *, tb=8192):
    """ValueNetwork forward.

    x: (B, D); w1: (D, H); b1: (1, H); w2: (H, O); b2: (1, O).
    Weights are stored (in, out), i.e. transposed w.r.t. PyTorch's nn.Linear.
    """
    B, D = x.shape
    H = w1.shape[1]
    O = w2.shape[1]

    cost = pl.CostEstimate(
        flops=2 * B * (D * H + H * O),
        transcendentals=0,
        bytes_accessed=(x.size * x.dtype.itemsize
                        + w1.size * w1.dtype.itemsize
                        + b1.size * b1.dtype.itemsize
                        + w2.size * w2.dtype.itemsize
                        + b2.size * b2.dtype.itemsize
                        + B * O * x.dtype.itemsize))

    out_shape = jax.ShapeDtypeStruct((B, O), x.dtype)

    if B <= 16:
        # Truly tiny batch: one grid-free block, zero per-step grid overhead.
        return pl.pallas_call(
            value_net_kernel,
            out_shape=out_shape,
            cost_estimate=cost,
        )(x, w1, b1, w2, b2)

    # Batch-tiled grid. Weights/biases use a constant index_map so they stay
    # VMEM-resident across all grid steps (no re-DMA). The batch axis is
    # 'parallel' so v7x shards it across both TensorCores; we always emit at
    # least 2 blocks (when B > 16) so neither TC idles, and cap the tile at
    # `tb` (default 8192) to amortize the ~0.35 us/step grid overhead while
    # staying far under the scoped-VMEM default on every generation.
    tile = min(tb, _round_up(pl.cdiv(B, 2), 8))   # multiple of 8 sublanes
    nb = pl.cdiv(B, tile)                          # last block may be ragged
    return pl.pallas_call(
        value_net_kernel,
        out_shape=out_shape,
        grid=(nb,),
        in_specs=[
            pl.BlockSpec((tile, D), lambda i: (i, 0)),   # x: batch tile
            pl.BlockSpec((D, H), lambda i: (0, 0)),      # w1: resident
            pl.BlockSpec((1, H), lambda i: (0, 0)),      # b1: resident
            pl.BlockSpec((H, O), lambda i: (0, 0)),      # w2: resident
            pl.BlockSpec((1, O), lambda i: (0, 0)),      # b2: resident
        ],
        out_specs=pl.BlockSpec((tile, O), lambda i: (i, 0)),  # narrow (B, O)
        compiler_params=pltpu.CompilerParams(
            dimension_semantics=("parallel",)),
        cost_estimate=cost,
    )(x, w1, b1, w2, b2)


def init_params(key, input_dim, output_dim, hidden=256, dtype=jnp.float32):
    """nn.Linear-style init (U[-1/sqrt(fan_in), +]); weights stored (in, out).

    Pass dtype=jnp.bfloat16 for the MXU-native bf16 path (accumulation stays
    f32 inside the kernel; loosen the allclose tolerance accordingly).
    """
    k1, k2, k3, k4 = jax.random.split(key, 4)
    bound1 = 1.0 / (input_dim ** 0.5)
    bound2 = 1.0 / (hidden ** 0.5)
    w1 = jax.random.uniform(k1, (input_dim, hidden), jnp.float32, -bound1, bound1)
    b1 = jax.random.uniform(k2, (1, hidden), jnp.float32, -bound1, bound1)
    w2 = jax.random.uniform(k3, (hidden, output_dim), jnp.float32, -bound2, bound2)
    b2 = jax.random.uniform(k4, (1, output_dim), jnp.float32, -bound2, bound2)
    return tuple(p.astype(dtype) for p in (w1, b1, w2, b2))


if __name__ == "__main__":
    key = jax.random.PRNGKey(0)
    kx, kp, kx2 = jax.random.split(key, 3)

    batch, input_dim, output_dim = 8, 32, 8
    x = jax.random.normal(kx, (batch, input_dim), jnp.float32)
    w1, b1, w2, b2 = init_params(kp, input_dim, output_dim)

    # Path 1: tiny batch -> single grid-free block.
    out = jax.block_until_ready(value_network_forward(x, w1, b1, w2, b2))
    ref = jnp.maximum(x @ w1 + b1, 0.0) @ w2 + b2
    assert out.shape == (batch, output_dim)
    assert jnp.allclose(out, ref, atol=1e-5, rtol=1e-5)

    # Path 2: larger batch -> batch-tiled 'parallel' grid (2 blocks here).
    batch2 = 64
    x2 = jax.random.normal(kx2, (batch2, input_dim), jnp.float32)
    out2 = jax.block_until_ready(value_network_forward(x2, w1, b1, w2, b2))
    ref2 = jnp.maximum(x2 @ w1 + b1, 0.0) @ w2 + b2
    assert out2.shape == (batch2, output_dim)
    assert jnp.allclose(out2, ref2, atol=1e-5, rtol=1e-5)

    # Path 3: bf16 weights/activations -> MXU-native path, f32 accumulation.
    wb16 = tuple(p.astype(jnp.bfloat16) for p in (w1, b1, w2, b2))
    xb16 = x2.astype(jnp.bfloat16)
    outb = jax.block_until_ready(value_network_forward(xb16, *wb16))
    refb = (jnp.maximum(xb16.astype(jnp.float32) @ wb16[0].astype(jnp.float32)
                        + wb16[1].astype(jnp.float32), 0.0)
            @ wb16[2].astype(jnp.float32) + wb16[3].astype(jnp.float32))
    assert outb.shape == (batch2, output_dim)
    assert jnp.allclose(outb.astype(jnp.float32), refb, atol=5e-2, rtol=5e-2)

    print("KERNEL_OK")
</pallas_src>

<mosaic_0001>
module attributes {stable_mosaic.version = 11 : i64} {
  func.func @value_net_kernel(%arg0: memref<8x32xf32, #tpu.memory_space<vmem>>, %arg1: memref<32x256xf32, #tpu.memory_space<vmem>>, %arg2: memref<1x256xf32, #tpu.memory_space<vmem>>, %arg3: memref<256x8xf32, #tpu.memory_space<vmem>>, %arg4: memref<1x8xf32, #tpu.memory_space<vmem>>, %arg5: memref<8x8xf32, #tpu.memory_space<vmem>>) attributes {dimension_semantics = [], scalar_prefetch = 0 : i64, scratch_operands = 0 : i64, tpu.core_type = #tpu.core_type<tc>} {
    %c0 = arith.constant 0 : index
    %c0_0 = arith.constant 0 : index
    %0 = vector.load %arg0[%c0, %c0_0] : memref<8x32xf32, #tpu.memory_space<vmem>>, vector<8x32xf32>
    %c0_1 = arith.constant 0 : index
    %c0_2 = arith.constant 0 : index
    %1 = vector.load %arg1[%c0_1, %c0_2] : memref<32x256xf32, #tpu.memory_space<vmem>>, vector<32x256xf32>
    %cst = arith.constant dense<0.000000e+00> : vector<8x256xf32>
    %2 = tpu.matmul %0, %1, %cst {dimension_numbers = #tpu.dot_dimension_numbers<[1], [0], [0], [1], [0, 0, 1, 1], [], []>} : vector<8x32xf32>, vector<32x256xf32>, vector<8x256xf32> -> vector<8x256xf32>
    %c0_3 = arith.constant 0 : index
    %c0_4 = arith.constant 0 : index
    %3 = vector.load %arg2[%c0_3, %c0_4] : memref<1x256xf32, #tpu.memory_space<vmem>>, vector<1x256xf32>
    %4 = vector.broadcast %3 : vector<1x256xf32> to vector<8x256xf32>
    %5 = arith.addf %2, %4 : vector<8x256xf32>
    %cst_5 = arith.constant 0.000000e+00 : f32
    %6 = vector.broadcast %cst_5 : f32 to vector<8x256xf32>
    %7 = arith.maximumf %5, %6 : vector<8x256xf32>
    %c0_6 = arith.constant 0 : index
    %c0_7 = arith.constant 0 : index
    %8 = vector.load %arg3[%c0_6, %c0_7] : memref<256x8xf32, #tpu.memory_space<vmem>>, vector<256x8xf32>
    %cst_8 = arith.constant dense<0.000000e+00> : vector<8x8xf32>
    %9 = tpu.matmul %7, %8, %cst_8 {dimension_numbers = #tpu.dot_dimension_numbers<[1], [0], [0], [1], [0, 0, 1, 1], [], []>} : vector<8x256xf32>, vector<256x8xf32>, vector<8x8xf32> -> vector<8x8xf32>
    %c0_9 = arith.constant 0 : index
    %c0_10 = arith.constant 0 : index
    %10 = vector.load %arg4[%c0_9, %c0_10] : memref<1x8xf32, #tpu.memory_space<vmem>>, vector<1x8xf32>
    %11 = vector.broadcast %10 : vector<1x8xf32> to vector<8x8xf32>
    %12 = arith.addf %9, %11 : vector<8x8xf32>
    %c0_11 = arith.constant 0 : index
    %c0_12 = arith.constant 0 : index
    %13 = vector.load %arg5[%c0_11, %c0_12] : memref<8x8xf32, #tpu.memory_space<vmem>>, vector<8x8xf32>
    tpu.vector_store %arg5[%c0_11, %c0_12], %12 {strides = array<i32>} : memref<8x8xf32, #tpu.memory_space<vmem>>, vector<8x8xf32>,
    return
  }
}

</mosaic_0001>

<bundles_post_ra>
// kernel: tpu_custom_call.1
= control target key start
LH: loop header
LB: loop body
LE: loop exit
PB: predicated region body
PF: predicated region fallthrough
CT: control target
= control target key end

     0   :  { %v305_v4 = vmov 0.0   ;;  %vm42_vm0 = vcmask 261120   ;;  %s469_s0 = inlined_call_operand.vmem [shape: f32[8,32], index: 0, kind: input, shape index: {}]   ;;  %s470_s1 = inlined_call_operand.vmem [shape: f32[32,256], index: 1, kind: input, shape index: {}]   ;;  %s471_s2 = inlined_call_operand.vmem [shape: f32[1,256], index: 2, kind: input, shape index: {}]   ;;  %s472_s3 = inlined_call_operand.vmem [shape: f32[256,8], index: 3, kind: input, shape index: {}]   ;;  %s473_s4 = inlined_call_operand.vmem [shape: f32[1,8], index: 4, kind: input, shape index: {}]   ;;  %s474_s5 = inlined_call_operand.hbm [shape: f32[8,8], index: 5, kind: output, shape index: {}]  }
   0x1   :  { %v29_v0 = vld [vmem:[%s470_s1 + $0x38] sm:$0xff]  ;;  %v28_v1 = vld [vmem:[%s470_s1 + $0x30] sm:$0xff]  ;;  %v27_v2 = vld [vmem:[%s470_s1 + $0x28] sm:$0xff]  ;;  %110 = vmatprep.mubr.f32.mxu0 %v305_v4 }
   0x2   :  { %70 = vmatprep.subr.mxu0 %v29_v0  ;;  %v26_v3 = vld [vmem:[%s470_s1 + $0x20] sm:$0xff]  ;;  %v25_v5 = vld [vmem:[%s470_s1 + $0x18] sm:$0xff]  ;;  %v24_v6 = vld [vmem:[%s470_s1 + $0x10] sm:$0xff] }
   0x3   :  { %71 = vmatpush1.msra.mxu0 %v28_v1  ;;  %v150_v7 = vld [vmem:[%s472_s3 + $0xf8] sm:$0xff]  ;;  %v149_v9 = vld [vmem:[%s472_s3 + $0xf0] sm:$0xff]  ;;  %v23_v10 = vld [vmem:[%s470_s1 + $0x8] sm:$0xff] }
   0x4   :  { %72 = vmatprep.subr.mxu0 %v27_v2  ;;  %v134_v8 = vld [vmem:[%s472_s3 + $0x78] sm:$0xff]  ;;  %246 = vmatprep.subr.mxu1 %v150_v7  ;;  %v133_v11 = vld [vmem:[%s472_s3 + $0x70] sm:$0xff]  ;;  %v22_v12 = vld [vmem:[%s470_s1] sm:$0xff] }
   0x5   :  { %73 = vmatpush1.msra.mxu0 %v26_v3  ;;  %247 = vmatpush3.msra.mxu1 %v134_v8  ;;  %v148_v13 = vld [vmem:[%s472_s3 + $0xe8] sm:$0xff]  ;;  %v21_v14 = vld [vmem:[%s469_s0] sm:$0xff]  ;;  %v146_v18 = vld [vmem:[%s472_s3 + $0xd8] sm:$0xff] }
   0x6   :  { %74 = vmatprep.subr.mxu0 %v25_v5  ;;  %248 = vmatprep.subr.mxu1 %v149_v9  ;;  %v132_v15 = vld [vmem:[%s472_s3 + $0x68] sm:$0xff]  ;;  %v147_v16 = vld [vmem:[%s472_s3 + $0xe0] sm:$0xff]  ;;  %v130_v19 = vld [vmem:[%s472_s3 + $0x58] sm:$0xff] }
   0x7   :  { %75 = vmatpush1.msra.mxu0 %v24_v6  ;;  %249 = vmatpush3.msra.mxu1 %v133_v11  ;;  %v131_v17 = vld [vmem:[%s472_s3 + $0x60] sm:$0xff]  ;;  %v145_v20 = vld [vmem:[%s472_s3 + $0xd0] sm:$0xff] }
   0x8   :  { %76 = vmatprep.subr.mxu0 %v23_v10  ;;  %250 = vmatprep.subr.mxu1 %v148_v13 }
   0x9   :  { %77 = vmatpush1.msra.mxu0 %v22_v12  ;;  %251 = vmatpush3.msra.mxu1 %v132_v15 }
   0xa   :  { %244 = vmatmul.mubr.msk.f32.vlgmr.msra.gmra.mxu0 %vm42_vm0, %v21_v14  ;;  %252 = vmatprep.subr.mxu1 %v147_v16 }
   0xb   :  { %253 = vmatpush3.msra.mxu1 %v131_v17 }
   0xc   :  { %10 = vsyncpa [#allocation3], 0  ;;  %254 = vmatprep.subr.mxu1 %v146_v18  ;;  %v129_v21 = vld [vmem:[%s472_s3 + $0x50] sm:$0xff]  ;;  %v144_v22 = vld [vmem:[%s472_s3 + $0xc8] sm:$0xff]  ;;  %v32_v42 = vlaneseq  ;;  %s306_s1 = smov [#allocation2]   ;;  %vm228_vm1 = vcmask 64512  }
   0xd   :  { %255 = vmatpush3.msra.mxu1 %v130_v19  ;;  %v128_v23 = vld [vmem:[%s472_s3 + $0x48] sm:$0xff]  ;;  %v143_v24 = vld [vmem:[%s472_s3 + $0xc0] sm:$0xff]  ;;  %v142_v26 = vld [vmem:[%s472_s3 + $0xb8] sm:$0xff]  ;;  %s236_s24 = sshll.u32 %s306_s1, 4  ;;  %s237_s24 = int_to_ptr.vmem [resolvable:$true] %s236_s24 }
   0xe   :  { %256 = vmatprep.subr.mxu1 %v145_v20  ;;  %v127_v25 = vld [vmem:[%s472_s3 + $0x40] sm:$0xff]  ;;  %v126_v27 = vld [vmem:[%s472_s3 + $0x38] sm:$0xff]  ;;  %v141_v28 = vld [vmem:[%s472_s3 + $0xb0] sm:$0xff]  ;;  %v33_v43 = vshrl.u32 %v32_v42, 7  ;;  %p288_p1 = scmp.lt.s32.totalorder %s237_s24, %s237_s24 }
   0xf   :  { %257 = vmatpush3.msra.mxu1 %v129_v21  ;;  %v125_v29 = vld [vmem:[%s472_s3 + $0x30] sm:$0xff]  ;;  %v140_v30 = vld [vmem:[%s472_s3 + $0xa8] sm:$0xff]  ;;  %v139_v32 = vld [vmem:[%s472_s3 + $0xa0] sm:$0xff] }
  0x10   :  { %258 = vmatprep.subr.mxu1 %v144_v22  ;;  %v124_v31 = vld [vmem:[%s472_s3 + $0x28] sm:$0xff]  ;;  %v123_v33 = vld [vmem:[%s472_s3 + $0x20] sm:$0xff]  ;;  %v138_v34 = vld [vmem:[%s472_s3 + $0x98] sm:$0xff]  ;;  %v34_v44 = vsub.s32 0, %v33_v43  ;;  %v38_v46 = vsub.s32 1, %v33_v43 }
  0x11   :  { %259 = vmatpush3.msra.mxu1 %v128_v23  ;;  %v122_v35 = vld [vmem:[%s472_s3 + $0x18] sm:$0xff]  ;;  %v137_v36 = vld [vmem:[%s472_s3 + $0x90] sm:$0xff]  ;;  %v136_v38 = vld [vmem:[%s472_s3 + $0x88] sm:$0xff] }
  0x12   :  { %260 = vmatprep.subr.mxu1 %v143_v24  ;;  %v121_v37 = vld [vmem:[%s472_s3 + $0x10] sm:$0xff]  ;;  %v120_v39 = vld [vmem:[%s472_s3 + $0x8] sm:$0xff]  ;;  %v135_v40 = vld [vmem:[%s472_s3 + $0x80] sm:$0xff] }
  0x13   :  { %261 = vmatpush3.msra.mxu1 %v127_v25  ;;  %v119_v41 = vld [vmem:[%s472_s3] sm:$0xff] }
  0x14   :  { %262 = vmatprep.subr.mxu1 %v142_v26  ;;  %v30_v45 = vld [vmem:[%s471_s2] sm:$0x3]  ;;  %s283_s2 = scalar_lea.vmem %s237_s24, 128 }
  0x15   :  { %263 = vmatpush3.msra.mxu1 %v126_v27  ;;  %v35_v47 = vrot.slane %v30_v45, %v34_v44  ;;  %v39_v48 = vrot.slane %v30_v45, %v38_v46  ;;  %v245_v56 = vld [vmem:[%s473_s4] ss:$0 sm:$0xff]  ;;  %p284_p0 = scmp.ne.s32.totalorder %s237_s24, %s283_s2  ;;  %p289_p2 = scmp.lt.s32.totalorder %s283_s2, %s283_s2 }
  0x16   :  { %264 = vmatprep.subr.mxu1 %v141_v28 }
  0x17   :  { %265 = vmatpush3.msra.mxu1 %v125_v29  ;;  %p290_p3 = por %p289_p2, %p288_p1 }
  0x18   :  { %266 = vmatprep.subr.mxu1 %v140_v30 }
  0x19   :  { %267 = vmatpush3.msra.mxu1 %v124_v31  ;;  %p291_p4 = pnand %p290_p3, %p284_p0 }
  0x1a   :  { %268 = vmatprep.subr.mxu1 %v139_v32 }
  0x1b   :  { %269 = vmatpush3.msra.mxu1 %v123_v33 }
  0x1c   :  { %270 = vmatprep.subr.mxu1 %v138_v34 }
  0x1d   :  { %271 = vmatpush3.msra.mxu1 %v122_v35 }
  0x1e   :  { %272 = vmatprep.subr.mxu1 %v137_v36 }
  0x1f   :  { %273 = vmatpush3.msra.mxu1 %v121_v37 }
  0x20   :  { %274 = vmatprep.subr.mxu1 %v136_v38 }
  0x21   :  { %275 = vmatpush3.msra.mxu1 %v120_v39 }
  0x22   :  { %276 = vmatprep.subr.mxu1 %v135_v40 }
  0x23   :  { %277 = vmatpush3.msra.mxu1 %v119_v41 }
  0xca   :  { %v112_v49 = vpop.f32.mrf.mxu0 }
  0xcb   :  { %v113_v50 = vadd.f32 %v112_v49, %v35_v47 }
  0xcc   :  { %v114_v51 = vpop.f32.mrf.mxu0 }
  0xcd   :  { %v115_v52 = vadd.f32 %v114_v51, %v39_v48  ;;  %v117_v54 = vmax.f32 %v113_v50, 0.0 }
  0xcf   :  { %v118_v53 = vmax.f32 %v115_v52, 0.0 }
  0xd1   :  { %222 = vmatprep.mubr.f32.mxu1 %v118_v53 }
  0xd2   :  { %223 = vmatmul.mubr.f32.vlgmr.msra.gmra.mxu1 %v117_v54 }
 0x192   :  { %v278_v55 = vpop.f32.mrf.mxu1 }
 0x194   :  { %v279_v57 = vpop.f32.mrf.mxu1 }
 0x195   :  { %v280_v58 = vadd.f32 %v279_v57, %v278_v55 }
 0x197   :  { %v225_v59 = vadd.f32 %v280_v58, %v245_v56 }
 0x199   :  { %229 = vst.msk [vmem:[#allocation2] sm:$0xff] %vm228_vm1, %v225_v59 }
 0x19a   :  { %294 = shalt.err (!%p291_p4)
}
 0x19b   :  { %239 = dma.vmem_to_hbm [thread:$0]  %s237_s24, 128, %s474_s5, [#allocation3]  }
 0x19c   :  { %303 = dma.done.wait [#allocation3], 128  }
 0x19d   :  { %304 = vsyncadd [#allocation3], 4294967168 }
 0x19e   :  { %243 = vsyncpa [#allocation3], 1 }

</bundles_post_ra>
